<compile_context>
chip_gen: v6e
topology: v6e:2x2x1
jax: 0.10.0
libtpu: 0.0.40
codegen_flags: <defaults>
</compile_context>

<pallas_src>
import numpy as np
import jax
import jax.numpy as jnp
from jax.experimental import pallas as pl
from jax.experimental.pallas import tpu as pltpu


_LANE_ALIGN = 256   # MXU-facing dims (K, N): pad/tile to multiples of 256
_SUB_ALIGN = 16     # M: pad to multiples of 16 (bf16 sublane packing)


def _round_up(v, m):
    return (v + m - 1) // m * m


def _pick_tile(padded_dim, pref, align):
    """Largest multiple of `align` that divides `padded_dim` and is <= pref."""
    t = min(pref, padded_dim)
    t -= t % align
    while padded_dim % t != 0:
        t -= align
    return t


def _int8_wrap_f32(q):
    # Emulate torch's float->int8 cast (two's-complement wraparound) on
    # integer-valued floats via int32 bit ops.
    qi = q.astype(jnp.int32)
    return (((qi + 128) & 0xFF) - 128).astype(jnp.float32)


def quantize_tensor(w):
    """Mirror of Int8Linear.quantize (init-time, plain JAX)."""
    w_max = jnp.max(w)
    w_min = jnp.min(w)
    scale = (w_max - w_min) / 255.0
    zp = jnp.round((w_max * (-128.0) - w_min * 127.0) / (w_max - w_min))
    q = _int8_wrap_f32(jnp.round(w / scale) + zp).astype(jnp.int8)
    return q, scale, zp


def prepack_weight_and_bias(w_q, w_zp, bias):
    """Init-time pre-pack: (w_q - w_zp) as bf16 in K-major [Kp, Np] layout,
    zero-padded to multiples of 256, and bias padded to [1, Np].

    Values are integers in [-255, 255] -> exact in bf16.  Zero-padded K rows of
    the weight guarantee that (possibly nonzero, wrapped) padded activation
    columns contribute exactly 0 to the matmul.
    """
    N, K = w_q.shape
    Kp = _round_up(K, _LANE_ALIGN)
    Np = _round_up(N, _LANE_ALIGN)
    w_c = w_q.astype(jnp.float32).T - w_zp.astype(jnp.float32)        # [K, N]
    w_c = jnp.pad(w_c, ((0, Kp - K), (0, Np - N))).astype(jnp.bfloat16)
    b = jnp.pad(bias.astype(jnp.float32), (0, Np - N)).reshape(1, Np)
    return w_c, b


# ---------------------------------------------------------------------------
# Pass 1: dynamic activation quantization (one pass over x, bf16 output).
# ---------------------------------------------------------------------------
def _quant_kernel(params_ref, x_ref, o_ref):
    inv_scale = params_ref[0]            # 1 / x_scale
    zp = params_ref[1]                   # activation zero point (integer f32)
    x = x_ref[...].astype(jnp.float32)
    q = jnp.round(x * inv_scale) + zp
    wrapped = _int8_wrap_f32(q)          # torch int8-cast wraparound
    o_ref[...] = (wrapped - zp).astype(jnp.bfloat16)   # |v| <= 255 -> exact


# ---------------------------------------------------------------------------
# Pass 2: tiled bf16 MXU matmul with resident f32 accumulator + dequant/bias.
# ---------------------------------------------------------------------------
def _int8_matmul_kernel(dq_ref, x_ref, w_ref, b_ref, o_ref, acc_ref):
    k = pl.program_id(2)

    @pl.when(k == 0)
    def _init():
        acc_ref[...] = jnp.zeros_like(acc_ref)

    acc_ref[...] += jnp.dot(x_ref[...], w_ref[...],
                            preferred_element_type=jnp.float32)

    @pl.when(k == pl.num_programs(2) - 1)
    def _epilogue():
        o_ref[...] = (acc_ref[...] * dq_ref[0] + b_ref[...]).astype(o_ref.dtype)


def int8_linear_forward(x, w_packed, bias_packed, w_scale, out_features,
                        *, tm=512, tn=512, tk=512):
    """x: (..., K) float; w_packed: [Kp, Np] bf16 (w_q - w_zp); bias_packed: [1, Np]."""
    lead, K = x.shape[:-1], x.shape[-1]
    Kp, Np = w_packed.shape
    assert Kp == _round_up(K, _LANE_ALIGN)
    N = out_features
    M = int(np.prod(lead)) if lead else 1
    x2d = x.reshape(M, K)

    # Dynamic per-tensor activation quant params (single cheap XLA reduction).
    x_max = jnp.max(x2d).astype(jnp.float32)
    x_min = jnp.min(x2d).astype(jnp.float32)
    rng = x_max - x_min
    rng = jnp.where(rng > 0, rng, jnp.float32(1.0))   # guard constant input
    x_scale = rng / 255.0
    x_zp = jnp.round((x_max * (-128.0) - x_min * 127.0) / rng)
    q_params = jnp.stack([1.0 / x_scale, x_zp]).astype(jnp.float32)
    dq = (x_scale * w_scale.astype(jnp.float32)).reshape(1)   # x_scale * w_scale

    # --- tile plan ---
    tm_ = min(tm, _round_up(M, _SUB_ALIGN))
    Mp = _round_up(M, tm_)
    tn_ = _pick_tile(Np, tn, _LANE_ALIGN)
    tk_ = _pick_tile(Kp, tk, _LANE_ALIGN)
    # Megacore (v7x has 2 TCs): ensure >= 2 blocks along the parallel axes.
    if (Mp // tm_) * (Np // tn_) < 2 and Np // _LANE_ALIGN >= 2:
        tn_ = _pick_tile(Np, max(tn_ // 2, _LANE_ALIGN), _LANE_ALIGN)

    xp = jnp.pad(x2d, ((0, Mp - M), (0, Kp - K))) if (Mp, Kp) != (M, K) else x2d

    # Pass 1: quantize x ONCE (not once per N tile) to bf16 (x_q - x_zp).
    xq = pl.pallas_call(
        _quant_kernel,
        out_shape=jax.ShapeDtypeStruct((Mp, Kp), jnp.bfloat16),
        grid=(Mp // tm_, Kp // tk_),
        in_specs=[
            pl.BlockSpec(memory_space=pltpu.MemorySpace.SMEM),    # [1/x_scale, x_zp]
            pl.BlockSpec((tm_, tk_), lambda i, k: (i, k)),
        ],
        out_specs=pl.BlockSpec((tm_, tk_), lambda i, k: (i, k)),
        compiler_params=pltpu.CompilerParams(
            dimension_semantics=("parallel", "parallel")),
    )(q_params, xp)

    # Pass 2: tiled matmul + dequant + bias.
    grid = (Mp // tm_, Np // tn_, Kp // tk_)
    out = pl.pallas_call(
        _int8_matmul_kernel,
        out_shape=jax.ShapeDtypeStruct((Mp, Np), jnp.float32),
        grid=grid,
        in_specs=[
            pl.BlockSpec(memory_space=pltpu.MemorySpace.SMEM),    # [x_scale*w_scale]
            pl.BlockSpec((tm_, tk_), lambda i, j, k: (i, k)),     # bf16 activations
            pl.BlockSpec((tk_, tn_), lambda i, j, k: (k, j)),     # bf16 (w_q - w_zp), K-major
            pl.BlockSpec((1, tn_), lambda i, j, k: (0, j)),       # bias
        ],
        out_specs=pl.BlockSpec((tm_, tn_), lambda i, j, k: (i, j)),
        scratch_shapes=[pltpu.VMEM((tm_, tn_), jnp.float32)],     # resident f32 acc
        compiler_params=pltpu.CompilerParams(
            dimension_semantics=("parallel", "parallel", "arbitrary")),
        cost_estimate=pl.CostEstimate(
            flops=2 * Mp * Np * Kp,
            transcendentals=0,
            bytes_accessed=(grid[1] * Mp * Kp * 2        # x re-streamed per N tile
                            + grid[0] * Kp * Np * 2      # W re-streamed per M tile
                            + Mp * Np * 4),              # output writeback (f32)
        ),
    )(dq, xq, w_packed, bias_packed)

    return out[:M, :N].reshape(*lead, N)


def reference_forward(x, w_q, w_scale, w_zp, bias):
    """Pure-JAX mirror of Int8Linear.forward (uses x * (1/x_scale) like the kernel)."""
    x_max = jnp.max(x).astype(jnp.float32)
    x_min = jnp.min(x).astype(jnp.float32)
    rng = x_max - x_min
    rng = jnp.where(rng > 0, rng, jnp.float32(1.0))
    x_scale = rng / 255.0
    x_zp = jnp.round((x_max * (-128.0) - x_min * 127.0) / rng)
    x_q = _int8_wrap_f32(jnp.round(x.astype(jnp.float32) * (1.0 / x_scale)) + x_zp)
    w_c = w_q.astype(jnp.float32).T - w_zp
    out = jnp.dot(x_q - x_zp, w_c, preferred_element_type=jnp.float32)
    return out * (x_scale * w_scale) + bias


if __name__ == "__main__":
    key = jax.random.PRNGKey(0)
    k_w, k_b, k_x, k_w2, k_b2, k_x2 = jax.random.split(key, 6)

    # Small shape consistent with the module (batch=2, seq=8, hidden 32 -> 64).
    batch, seq, in_f, out_f = 2, 8, 32, 64
    w = jax.random.normal(k_w, (out_f, in_f), jnp.float32) * 0.1
    b = jax.random.normal(k_b, (out_f,), jnp.float32) * 0.1
    x = jax.random.normal(k_x, (batch, seq, in_f), jnp.float32)

    w_q, w_scale, w_zp = quantize_tensor(w)                # __init__-time quantization
    w_c, b_pack = prepack_weight_and_bias(w_q, w_zp, b)    # __init__-time pre-pack + pad

    out = jax.block_until_ready(int8_linear_forward(x, w_c, b_pack, w_scale, out_f))
    ref = reference_forward(x, w_q, w_scale, w_zp, b)
    assert out.shape == (batch, seq, out_f)
    np.testing.assert_allclose(np.asarray(out), np.asarray(ref), rtol=1e-5, atol=1e-4)

    # Larger shape: multi-tile N (megacore split) and multi-step K accumulation.
    batch2, seq2, in_f2, out_f2 = 2, 64, 768, 384
    w2 = jax.random.normal(k_w2, (out_f2, in_f2), jnp.float32) * 0.05
    b2 = jax.random.normal(k_b2, (out_f2,), jnp.float32) * 0.1
    x2 = jax.random.normal(k_x2, (batch2, seq2, in_f2), jnp.float32)
    w2_q, w2_scale, w2_zp = quantize_tensor(w2)
    w2_c, b2_pack = prepack_weight_and_bias(w2_q, w2_zp, b2)
    out2 = jax.block_until_ready(int8_linear_forward(x2, w2_c, b2_pack, w2_scale, out_f2))
    ref2 = reference_forward(x2, w2_q, w2_scale, w2_zp, b2)
    assert out2.shape == (batch2, seq2, out_f2)
    np.testing.assert_allclose(np.asarray(out2), np.asarray(ref2), rtol=1e-5, atol=1e-4)

    print("KERNEL_OK")
</pallas_src>

<mosaic_0001>
module attributes {stable_mosaic.version = 11 : i64} {
  func.func @_quant_kernel(%arg0: i32, %arg1: i32, %arg2: memref<2xf32, #tpu.memory_space<smem>>, %arg3: memref<16x256xf32, #tpu.memory_space<vmem>>, %arg4: memref<16x256xbf16, #tpu.memory_space<vmem>>) attributes {dimension_semantics = [#tpu.dimension_semantics<parallel>, #tpu.dimension_semantics<parallel>], iteration_bounds = array<i64: 1, 1>, scalar_prefetch = 0 : i64, scratch_operands = 0 : i64, tpu.core_type = #tpu.core_type<tc>, window_params = [{transform_indices = @transform_0, window_bounds = array<i64: 2>}, {transform_indices = @transform_1, window_bounds = array<i64: 16, 256>}, {transform_indices = @transform_2, window_bounds = array<i64: 16, 256>}]} {
    %c0 = arith.constant 0 : index
    %0 = memref.load %arg2[%c0] : memref<2xf32, #tpu.memory_space<smem>>
    %c1 = arith.constant 1 : index
    %1 = memref.load %arg2[%c1] : memref<2xf32, #tpu.memory_space<smem>>
    %c0_0 = arith.constant 0 : index
    %c0_1 = arith.constant 0 : index
    %2 = vector.load %arg3[%c0_0, %c0_1] : memref<16x256xf32, #tpu.memory_space<vmem>>, vector<16x256xf32>
    %3 = vector.broadcast %0 : f32 to vector<16x256xf32>
    %4 = arith.mulf %2, %3 : vector<16x256xf32>
    %5 = math.roundeven %4 : vector<16x256xf32>
    %6 = vector.broadcast %1 : f32 to vector<16x256xf32>
    %7 = arith.addf %5, %6 : vector<16x256xf32>
    %8 = arith.fptosi %7 : vector<16x256xf32> to vector<16x256xi32>
    %c128_i32 = arith.constant 128 : i32
    %9 = vector.broadcast %c128_i32 : i32 to vector<16x256xi32>
    %10 = arith.addi %8, %9 : vector<16x256xi32>
    %c255_i32 = arith.constant 255 : i32
    %11 = vector.broadcast %c255_i32 : i32 to vector<16x256xi32>
    %12 = arith.andi %10, %11 : vector<16x256xi32>
    %c128_i32_2 = arith.constant 128 : i32
    %13 = vector.broadcast %c128_i32_2 : i32 to vector<16x256xi32>
    %14 = arith.subi %12, %13 : vector<16x256xi32>
    %15 = arith.sitofp %14 : vector<16x256xi32> to vector<16x256xf32>
    %16 = vector.broadcast %1 : f32 to vector<16x256xf32>
    %17 = arith.subf %15, %16 : vector<16x256xf32>
    %18 = arith.truncf %17 : vector<16x256xf32> to vector<16x256xbf16>
    %c0_3 = arith.constant 0 : index
    %c0_4 = arith.constant 0 : index
    %19 = vector.load %arg4[%c0_3, %c0_4] : memref<16x256xbf16, #tpu.memory_space<vmem>>, vector<16x256xbf16>
    tpu.vector_store %arg4[%c0_3, %c0_4], %18 {strides = array<i32>} : memref<16x256xbf16, #tpu.memory_space<vmem>>, vector<16x256xbf16>,
    return
  }
  func.func @transform_0(%arg0: i32, %arg1: i32) -> i32 {
    %c0_i32 = arith.constant 0 : i32
    %c0_i32_0 = arith.constant 0 : i32
    return %c0_i32 : i32
  }
  func.func @transform_1(%arg0: i32, %arg1: i32) -> (i32, i32) {
    %c0_i32 = arith.constant 0 : i32
    return %arg0, %arg1 : i32, i32
  }
  func.func @transform_2(%arg0: i32, %arg1: i32) -> (i32, i32) {
    %c0_i32 = arith.constant 0 : i32
    return %arg0, %arg1 : i32, i32
  }
}

</mosaic_0001>

<bundles_post_ra>
// kernel: tpu_custom_call.1
= control target key start
LH: loop header
LB: loop body
LE: loop exit
PB: predicated region body
PF: predicated region fallthrough
CT: control target
= control target key end

     0   :  { %7 = vsyncpa [#allocation5], 0  ;;  %s266_s0 = inlined_call_operand.hbm [shape: f32[2], index: 0, kind: input, shape index: {}]   ;;  %s267_s1 = inlined_call_operand.hbm [shape: f32[16,256], index: 1, kind: input, shape index: {}]   ;;  %s268_s2 = inlined_call_operand.hbm [shape: bf16[16,256], index: 2, kind: output, shape index: {}]  }
   0x1   :  { %8 = vsyncpa [#allocation3], 0 }
   0x2   :  { %9 = vsyncpa [#allocation4], 0  ;;  %s223_s9 = smov [#allocation2]   ;;  %s224_s12 = smov [#allocation6]  }
   0x3   :  { %17 = dma.hbm_to_smem %s266_s0, 16, %s223_s9, [#allocation5]  }
   0x4   :  { %s23_s13 = sshll.u32 %s224_s12, 4  ;;  %s24_s13 = int_to_ptr.vmem [resolvable:$true] %s23_s13 }
   0x5   :  { %s185_s14 = scalar_lea.vmem %s24_s13, 512  ;;  %p190_p1 = scmp.lt.s32.totalorder %s24_s13, %s24_s13 }
   0x6   :  { %p186_p0 = scmp.ne.s32.totalorder %s24_s13, %s185_s14  ;;  %p191_p2 = scmp.lt.s32.totalorder %s185_s14, %s185_s14 }
   0x8   :  { %p192_p3 = por %p191_p2, %p190_p1 }
   0xa   :  { %p193_p4 = pnand %p192_p3, %p186_p0 }
   0xc   :  { %196 = shalt.err (!%p193_p4)
}
   0xd   :  { %s225_s15 = smov 256   ;;  %s226_s16 = smov 16  }
   0xe   :  { %29 = dma.hbm_to_vmem [thread:$0]  %s267_s1, 512, %s24_s13, [#allocation3], %s225_s15, %s225_s15, %s226_s16  }
   0xf   :  { %217 = dma.done.wait [#allocation5], 16  }
  0x10   :  { %218 = vsyncadd [#allocation5], 4294967280 }
  0x11   :  { %219 = dma.done.wait [#allocation3], 512  }
  0x12   :  { %220 = vsyncadd [#allocation3], 4294966784 }
  0x13   :  { %36 = sfence }
  0x14   :  { %s37_s0 = sld [smem:[#allocation2]]  ;;  %v39_v0 = vld [vmem:[#allocation6] sm:$0xff]  ;;  %v40_v1 = vld [vmem:[#allocation6 + $0x8] sm:$0xff]  ;;  %v41_v2 = vld [vmem:[#allocation6 + $0x10] sm:$0xff]  ;;  %s227_s1 = smov [#allocation7]  }
  0x15   :  { %s113_s19 = sld [smem:[#allocation2 + $0x1]]  ;;  %v42_v4 = vld [vmem:[#allocation6 + $0x18] sm:$0xff]  ;;  %s100_s20 = sshll.u32 %s227_s1, 4  ;;  %s101_s20 = int_to_ptr.vmem [resolvable:$true] %s100_s20 }
  0x16   :  { %s197_s21 = scalar_lea.vmem %s101_s20, 256  ;;  %p202_p6 = scmp.lt.s32.totalorder %s101_s20, %s101_s20 }
  0x17   :  { %p198_p5 = scmp.ne.s32.totalorder %s101_s20, %s197_s21  ;;  %p203_p7 = scmp.lt.s32.totalorder %s197_s21, %s197_s21 }
  0x19   :  { %p204_p8 = por %p203_p7, %p202_p6 }
  0x1a   :  { %v43_v3 = vstv %s37_s0 }
  0x1b   :  { %v44_v5 = vmul.f32 %v43_v3, %v39_v0  ;;  %v45_v6 = vmul.f32 %v43_v3, %v40_v1  ;;  %v46_v7 = vmul.f32 %v43_v3, %v41_v2  ;;  %v47_v11 = vmul.f32 %v43_v3, %v42_v4  ;;  %p205_p9 = pnand %p204_p8, %p198_p5 }
  0x1c   :  { %v52_v26 = vstv %s113_s19 }
  0x1d   :  { %v122_v8 = vand.u32 2147483647, %v44_v5  ;;  %v124_v9 = vcvt.f32.s32 %v44_v5  ;;  %v130_v10 = vand.u32 2147483647, %v45_v6  ;;  %v132_v12 = vcvt.f32.s32 %v45_v6 }
  0x1e   :  { %v140_v13 = vcvt.f32.s32 %v46_v7  ;;  %v127_v15 = vand.u32 2147483648, %v44_v5  ;;  %v138_v16 = vand.u32 2147483647, %v46_v7  ;;  %v135_v18 = vand.u32 2147483648, %v45_v6 }
  0x1f   :  { %v125_v14 = vcvt.s32.f32 %v124_v9  ;;  %v133_v17 = vcvt.s32.f32 %v132_v12  ;;  %v143_v20 = vand.u32 2147483648, %v46_v7  ;;  %vm251_vm0 = vcmp.lt.f32.partialorder %v122_v8, 8388608.0 }
  0x20   :  { %v141_v19 = vcvt.s32.f32 %v140_v13  ;;  %vm255_vm1 = vcmp.lt.f32.partialorder %v130_v10, 8388608.0  ;;  %v148_v24 = vcvt.f32.s32 %v47_v11  ;;  %v146_v28 = vand.u32 2147483647, %v47_v11 }
  0x21   :  { %v126_v22 = vand.u32 2147483647, %v125_v14  ;;  %v134_v25 = vand.u32 2147483647, %v133_v17  ;;  %vm139_vm2 = vcmp.lt.f32.partialorder %v138_v16, 8388608.0  ;;  %v151_v31 = vand.u32 2147483648, %v47_v11 }
  0x22   :  { %v142_v27 = vand.u32 2147483647, %v141_v19  ;;  %v149_v30 = vcvt.s32.f32 %v148_v24  ;;  %vm147_vm3 = vcmp.lt.f32.partialorder %v146_v28, 8388608.0 }
  0x23   :  { %v128_v29 = vor.u32 %v127_v15, %v126_v22  ;;  %v136_v32 = vor.u32 %v135_v18, %v134_v25 }
  0x24   :  { %v144_v33 = vor.u32 %v143_v20, %v142_v27  ;;  %v150_v35 = vand.u32 2147483647, %v149_v30 }
  0x25   :  { %v129_v34 = vsel %vm251_vm0, %v128_v29, %v44_v5  ;;  %v137_v36 = vsel %vm255_vm1, %v136_v32, %v45_v6 }
  0x26   :  { %v53_v37 = vadd.f32 %v129_v34, %v52_v26  ;;  %v145_v38 = vsel %vm139_vm2, %v144_v33, %v46_v7  ;;  %v54_v39 = vadd.f32 %v137_v36, %v52_v26  ;;  %v152_v40 = vor.u32 %v151_v31, %v150_v35 }
  0x27   :  { %v55_v41 = vadd.f32 %v145_v38, %v52_v26 }
  0x28   :  { %v154_v42 = vtrunc.f32 %v53_v37  ;;  %v156_v43 = vtrunc.f32 %v54_v39  ;;  %v153_v44 = vsel %vm147_vm3, %v152_v40, %v47_v11 }
  0x29   :  { %v158_v45 = vtrunc.f32 %v55_v41  ;;  %v56_v47 = vadd.f32 %v153_v44, %v52_v26 }
  0x2a   :  { %v155_v46 = vcvt.f32.s32 %v154_v42  ;;  %v157_v48 = vcvt.f32.s32 %v156_v43 }
  0x2b   :  { %v159_v49 = vcvt.f32.s32 %v158_v45  ;;  %v160_v51 = vtrunc.f32 %v56_v47 }
  0x2c   :  { %v61_v50 = vadd.s32 128, %v155_v46  ;;  %v62_v52 = vadd.s32 128, %v157_v48 }
  0x2d   :  { %v63_v53 = vadd.s32 128, %v159_v49  ;;  %v161_v55 = vcvt.f32.s32 %v160_v51 }
  0x2e   :  { %v65_v54 = vand.u32 255, %v61_v50  ;;  %v66_v56 = vand.u32 255, %v62_v52 }
  0x2f   :  { %v67_v57 = vand.u32 255, %v63_v53  ;;  %v64_v59 = vadd.s32 128, %v161_v55 }
  0x30   :  { %v114_v58 = vadd.s32 4294967168, %v65_v54  ;;  %v115_v60 = vadd.s32 4294967168, %v66_v56 }
  0x31   :  { %v116_v61 = vadd.s32 4294967168, %v67_v57  ;;  %v68_v63 = vand.u32 255, %v64_v59 }
  0x32   :  { %v73_v62 = vcvt.s32.f32 %v114_v58  ;;  %v74_v0 = vcvt.s32.f32 %v115_v60 }
  0x33   :  { %v75_v1 = vcvt.s32.f32 %v116_v61  ;;  %v117_v3 = vadd.s32 4294967168, %v68_v63 }
  0x34   :  { %v77_v2 = vsub.f32 %v73_v62, %v52_v26  ;;  %v78_v4 = vsub.f32 %v74_v0, %v52_v26 }
  0x35   :  { %v76_v5 = vcvt.s32.f32 %v117_v3  ;;  %v79_v6 = vsub.f32 %v75_v1, %v52_v26 }
  0x36   :  { %v120_v7 = vpack.c.bf16 %v78_v4, %v77_v2 }
  0x37   :  { %v80_v8 = vsub.f32 %v76_v5, %v52_v26 }
  0x38   :  { %93 = vst [vmem:[#allocation7] sm:$0xff] %v120_v7 }
  0x39   :  { %v121_v9 = vpack.c.bf16 %v80_v8, %v79_v6 }
  0x3b   :  { %94 = vst [vmem:[#allocation7 + $0x8] sm:$0xff] %v121_v9 }
  0x3c   :  { %208 = shalt.err (!%p205_p9)
}
  0x3d   :  { %s228_s22 = smov 128   ;;  %s229_s23 = smov 8  }
  0x3e   :  { %106 = dma.vmem_to_hbm [thread:$0]  %s101_s20, 256, %s268_s2, [#allocation4], %s228_s22, %s228_s22, %s229_s23  }
  0x3f   :  { %221 = dma.done.wait [#allocation4], 256  }
  0x40   :  { %222 = vsyncadd [#allocation4], 4294967040 }
  0x41   :  { %110 = vsyncpa [#allocation3], 1 }
  0x42   :  { %111 = vsyncpa [#allocation4], 1 }
  0x43   :  { %112 = vsyncpa [#allocation5], 1 }

</bundles_post_ra>
